<compile_context>
chip_gen: v5e
topology: v5e:2x2
jax: 0.10.0
libtpu: 0.0.40
codegen_flags: <defaults>
</compile_context>

<pallas_src>
import jax
import jax.numpy as jnp
from jax.experimental import pallas as pl
from jax.experimental.pallas import tpu as pltpu


# ----------------------------------------------------------------------------
# Fused Pallas kernel: BN1 -> ReLU -> Linear1 -> BN2 -> ReLU -> Linear2
#                      (+ bridge matmul + residual add + folded bias)
# ----------------------------------------------------------------------------
def _make_resblock_kernel(n_pad, n_valid, ci, co, has_bridge, eps=1e-5):
  inv_n = 1.0 / float(n_valid)
  need_row_mask = n_pad != n_valid

  def bn_relu(h, gamma, beta):
    # Single-pass training-mode BatchNorm1d (batch mean / biased variance).
    # Padded batch rows of h are exactly zero, so sums over all Np rows
    # normalized by the valid count give the correct statistics.
    s = jnp.sum(h, axis=0, keepdims=True)
    ss = jnp.sum(h * h, axis=0, keepdims=True)
    mean = s * inv_n
    var = ss * inv_n - mean * mean
    scale = gamma * jax.lax.rsqrt(var + eps)
    return jnp.maximum((h - mean) * scale + beta, 0.0)

  def kernel(x_ref, vec_ref, w1_ref, w2_ref, *rest):
    if has_bridge:
      wb_ref, o_ref = rest
    else:
      (o_ref,) = rest

    x = x_ref[...]                                      # (Np, ci) f32, pad rows = 0

    # Packed per-feature vectors (one operand): rows are
    #   0: gamma1  1: beta1  2: gamma2  3: beta2  4: b2 (+ bridge bias)
    g1 = vec_ref[pl.ds(0, 1), pl.ds(0, ci)]
    be1 = vec_ref[pl.ds(1, 1), pl.ds(0, ci)]
    g2 = vec_ref[pl.ds(2, 1), pl.ds(0, co)]
    be2 = vec_ref[pl.ds(3, 1), pl.ds(0, co)]
    b_out = vec_ref[pl.ds(4, 1), pl.ds(0, co)]

    h = bn_relu(x, g1, be1)                             # (Np, ci) f32
    if need_row_mask:
      # Keep padded batch rows exactly zero so BN2's stats stay mask-free.
      row_mask = (jax.lax.broadcasted_iota(jnp.int32, (n_pad, 1), 0)
                  < n_valid).astype(h.dtype)
      h = h * row_mask

    # NOTE: Linear1 bias omitted on purpose -- a per-feature constant on every
    # valid row cancels exactly in BN2's batch-mean subtraction.
    h = jnp.dot(h.astype(jnp.bfloat16), w1_ref[...],
                preferred_element_type=jnp.float32)     # (Np, co) f32 acc
    h = bn_relu(h, g2, be2)
    y = jnp.dot(h.astype(jnp.bfloat16), w2_ref[...],
                preferred_element_type=jnp.float32)     # (Np, co)

    if has_bridge:
      xb = jnp.dot(x.astype(jnp.bfloat16), wb_ref[...],
                   preferred_element_type=jnp.float32)  # (Np, co)
    else:
      xb = x                                            # identity bridge (ci == co)

    o_ref[...] = (xb + y + b_out).astype(o_ref.dtype)

  return kernel


# ----------------------------------------------------------------------------
# Wrappers
# ----------------------------------------------------------------------------
def _round_up(v, m):
  return (v + m - 1) // m * m


def resblock_apply_padded(x_pad, params, n_valid):
  """Padded-in / padded-out entry point (use this to chain blocks).

  x_pad: (Np, ci) f32, zero-padded (Np multiple of 8, ci multiple of 128).
  Returns (Np, co) f32, padded; rows >= n_valid are garbage (sliced off later).
  """
  np_, ci = x_pad.shape
  co, cm = params["co"], params["cm"]
  has_bridge = params["has_bridge"]
  assert ci == params["ci"]

  args = [x_pad, params["vecs"], params["w1p"], params["w2p"]]
  in_specs = [
      pl.BlockSpec((np_, ci), lambda i: (0, 0)),
      pl.BlockSpec((8, cm), lambda i: (0, 0)),
      pl.BlockSpec((ci, co), lambda i: (0, 0)),
      pl.BlockSpec((co, co), lambda i: (0, 0)),
  ]
  if has_bridge:
    args.append(params["wbp"])
    in_specs.append(pl.BlockSpec((ci, co), lambda i: (0, 0)))

  return pl.pallas_call(
      _make_resblock_kernel(np_, n_valid, ci, co, has_bridge),
      out_shape=jax.ShapeDtypeStruct((np_, co), jnp.float32),
      grid=(1,),
      in_specs=in_specs,
      out_specs=pl.BlockSpec((np_, co), lambda i: (0, 0)),
      compiler_params=pltpu.CompilerParams(
          dimension_semantics=("arbitrary",)),
  )(*args)


def resblock_linear_forward(x, params):
  """Convenience entry point: x (N, Cin) f32 -> (N, Cout) f32.

  In a multi-block network, pad once at entry and call resblock_apply_padded
  per block instead (avoids per-block activation pad/slice HBM round trips).
  """
  n, cin = x.shape
  assert cin == params["cin"]
  np_ = _round_up(n, 8)
  x_pad = jnp.pad(x.astype(jnp.float32),
                  ((0, np_ - n), (0, params["ci"] - cin)))
  out = resblock_apply_padded(x_pad, params, n)
  return out[:n, :params["cout"]]


# ----------------------------------------------------------------------------
# Parameter init: weight-norm fold + one-time padding / packing
# ----------------------------------------------------------------------------
def _weight_norm_linear(key, cin, cout):
  """Weight-normalised Linear: w = g * v / ||v||, norm over the input dim."""
  v = 0.1 * jax.random.normal(key, (cout, cin), jnp.float32)
  norm = jnp.sqrt(jnp.sum(v * v, axis=1, keepdims=True))        # (cout, 1)
  g = jnp.linspace(0.8, 1.2, cout, dtype=jnp.float32).reshape(cout, 1)
  w = g * v / norm                                              # (cout, cin)
  b = 0.01 * jnp.arange(cout, dtype=jnp.float32) - 0.02
  return jnp.transpose(w), b                                    # (cin, cout)


def _init_bn(c, idx):
  gamma = 1.0 + 0.02 * idx + 0.01 * jnp.arange(c, dtype=jnp.float32)
  beta = 0.01 * idx - 0.05 + 0.005 * jnp.arange(c, dtype=jnp.float32)
  return gamma, beta


def init_params(key, in_channels, out_channels):
  k1, k2, kb = jax.random.split(key, 3)
  w1, b1 = _weight_norm_linear(k1, in_channels, out_channels)
  w2, b2 = _weight_norm_linear(k2, out_channels, out_channels)
  g1, be1 = _init_bn(in_channels, 0)
  g2, be2 = _init_bn(out_channels, 1)
  has_bridge = in_channels != out_channels

  ref = {"bn1": (g1, be1), "w1": w1, "b1": b1,
         "bn2": (g2, be2), "w2": w2, "b2": b2}
  if has_bridge:
    wb, bb = _weight_norm_linear(kb, in_channels, out_channels)
    ref["wb"], ref["bb"] = wb, bb

  ci = _round_up(in_channels, 128)
  co = _round_up(out_channels, 128)
  cm = max(ci, co)

  def pad_w(w, rows, cols):
    return jnp.pad(w, ((0, rows - w.shape[0]),
                       (0, cols - w.shape[1]))).astype(jnp.bfloat16)

  b_out = b2 + ref["bb"] if has_bridge else b2
  vecs = jnp.zeros((8, cm), jnp.float32)
  vecs = vecs.at[0, :in_channels].set(g1)
  vecs = vecs.at[1, :in_channels].set(be1)
  vecs = vecs.at[2, :out_channels].set(g2)
  vecs = vecs.at[3, :out_channels].set(be2)
  vecs = vecs.at[4, :out_channels].set(b_out)

  params = {
      "cin": in_channels, "cout": out_channels,
      "ci": ci, "co": co, "cm": cm, "has_bridge": has_bridge,
      "vecs": vecs,
      "w1p": pad_w(w1, ci, co),
      "w2p": pad_w(w2, co, co),
      "ref": ref,
  }
  if has_bridge:
    params["wbp"] = pad_w(ref["wb"], ci, co)
  return params


# ----------------------------------------------------------------------------
# Plain-JAX f32 reference (PyTorch training-mode forward semantics)
# ----------------------------------------------------------------------------
def _reference_forward(x, params, eps=1e-5):
  hp = jax.lax.Precision.HIGHEST
  ref = params["ref"]

  def bn_relu(h, gamma, beta):
    mean = jnp.mean(h, axis=0)
    var = jnp.mean((h - mean) ** 2, axis=0)
    return jnp.maximum((h - mean) * gamma / jnp.sqrt(var + eps) + beta, 0.0)

  h = bn_relu(x, *ref["bn1"])
  h = jnp.dot(h, ref["w1"], precision=hp) + ref["b1"]
  h = bn_relu(h, *ref["bn2"])
  y = jnp.dot(h, ref["w2"], precision=hp) + ref["b2"]
  if "wb" in ref:
    xb = jnp.dot(x, ref["wb"], precision=hp) + ref["bb"]
  else:
    xb = x
  return xb + y


# ----------------------------------------------------------------------------
if __name__ == "__main__":
  key = jax.random.PRNGKey(0)
  kx, kp, kp2, kp3 = jax.random.split(key, 4)

  # bf16 MXU operands (f32 accumulation) vs. an f32 HIGHEST-precision
  # reference -> tolerance reflects bf16 operand rounding.
  def check(out, ref):
    assert jnp.all(jnp.isfinite(out))
    assert jnp.allclose(out, ref, rtol=5e-2, atol=5e-2), \
        float(jnp.max(jnp.abs(out - ref)))

  # Case 1: in_channels != out_channels -> weight-normed Linear bridge.
  n, in_channels, out_channels = 8, 16, 32
  x = jax.random.normal(kx, (n, in_channels), jnp.float32)
  params = init_params(kp, in_channels, out_channels)
  out = jax.block_until_ready(resblock_linear_forward(x, params))
  assert out.shape == (n, out_channels), out.shape
  check(out, _reference_forward(x, params))

  # Case 2: in_channels == out_channels -> identity bridge.
  params_id = init_params(kp2, out_channels, out_channels)
  x2 = jax.random.normal(kx, (n, out_channels), jnp.float32)
  out2 = jax.block_until_ready(resblock_linear_forward(x2, params_id))
  assert out2.shape == (n, out_channels), out2.shape
  check(out2, _reference_forward(x2, params_id))

  # Case 3: batch not a multiple of 8 -> exercises the (Np,1) row-mask path.
  n3 = 5
  params3 = init_params(kp3, in_channels, out_channels)
  x3 = jax.random.normal(kx, (n3, in_channels), jnp.float32)
  out3 = jax.block_until_ready(resblock_linear_forward(x3, params3))
  assert out3.shape == (n3, out_channels), out3.shape
  check(out3, _reference_forward(x3, params3))

  print("KERNEL_OK")
</pallas_src>

<mosaic_0001>
module attributes {stable_mosaic.version = 11 : i64} {
  func.func @kernel(%arg0: i32, %arg1: memref<8x128xf32, #tpu.memory_space<vmem>>, %arg2: memref<8x128xf32, #tpu.memory_space<vmem>>, %arg3: memref<128x128xbf16, #tpu.memory_space<vmem>>, %arg4: memref<128x128xbf16, #tpu.memory_space<vmem>>, %arg5: memref<128x128xbf16, #tpu.memory_space<vmem>>, %arg6: memref<8x128xf32, #tpu.memory_space<vmem>>) attributes {dimension_semantics = [#tpu.dimension_semantics<arbitrary>], iteration_bounds = array<i64: 1>, scalar_prefetch = 0 : i64, scratch_operands = 0 : i64, tpu.core_type = #tpu.core_type<tc>, window_params = [{pipeline_mode = #tpu.pipeline_mode<synchronous>, transform_indices = @transform_0, window_bounds = array<i64: 8, 128>}, {pipeline_mode = #tpu.pipeline_mode<synchronous>, transform_indices = @transform_1, window_bounds = array<i64: 8, 128>}, {pipeline_mode = #tpu.pipeline_mode<synchronous>, transform_indices = @transform_2, window_bounds = array<i64: 128, 128>}, {pipeline_mode = #tpu.pipeline_mode<synchronous>, transform_indices = @transform_3, window_bounds = array<i64: 128, 128>}, {pipeline_mode = #tpu.pipeline_mode<synchronous>, transform_indices = @transform_4, window_bounds = array<i64: 128, 128>}, {pipeline_mode = #tpu.pipeline_mode<synchronous>, transform_indices = @transform_5, window_bounds = array<i64: 8, 128>}]} {
    %c0 = arith.constant 0 : index
    %c0_0 = arith.constant 0 : index
    %0 = vector.load %arg1[%c0, %c0_0] : memref<8x128xf32, #tpu.memory_space<vmem>>, vector<8x128xf32>
    %c0_1 = arith.constant 0 : index
    %c0_2 = arith.constant 0 : index
    %1 = vector.load %arg2[%c0_1, %c0_2] : memref<8x128xf32, #tpu.memory_space<vmem>>, vector<1x128xf32>
    %c1 = arith.constant 1 : index
    %c0_3 = arith.constant 0 : index
    %2 = vector.load %arg2[%c1, %c0_3] : memref<8x128xf32, #tpu.memory_space<vmem>>, vector<1x128xf32>
    %c2 = arith.constant 2 : index
    %c0_4 = arith.constant 0 : index
    %3 = vector.load %arg2[%c2, %c0_4] : memref<8x128xf32, #tpu.memory_space<vmem>>, vector<1x128xf32>
    %c3 = arith.constant 3 : index
    %c0_5 = arith.constant 0 : index
    %4 = vector.load %arg2[%c3, %c0_5] : memref<8x128xf32, #tpu.memory_space<vmem>>, vector<1x128xf32>
    %c4 = arith.constant 4 : index
    %c0_6 = arith.constant 0 : index
    %5 = vector.load %arg2[%c4, %c0_6] : memref<8x128xf32, #tpu.memory_space<vmem>>, vector<1x128xf32>
    %cst = arith.constant dense<0.000000e+00> : vector<128xf32>
    %6 = vector.multi_reduction <add>, %0, %cst [0] : vector<8x128xf32> to vector<128xf32>
    %7 = vector.shape_cast %6 : vector<128xf32> to vector<1x128xf32>
    %8 = arith.mulf %0, %0 : vector<8x128xf32>
    %cst_7 = arith.constant dense<0.000000e+00> : vector<128xf32>
    %9 = vector.multi_reduction <add>, %8, %cst_7 [0] : vector<8x128xf32> to vector<128xf32>
    %10 = vector.shape_cast %9 : vector<128xf32> to vector<1x128xf32>
    %cst_8 = arith.constant 1.250000e-01 : f32
    %11 = vector.broadcast %cst_8 : f32 to vector<1x128xf32>
    %12 = arith.mulf %7, %11 : vector<1x128xf32>
    %cst_9 = arith.constant 1.250000e-01 : f32
    %13 = vector.broadcast %cst_9 : f32 to vector<1x128xf32>
    %14 = arith.mulf %10, %13 : vector<1x128xf32>
    %15 = arith.mulf %12, %12 : vector<1x128xf32>
    %16 = arith.subf %14, %15 : vector<1x128xf32>
    %cst_10 = arith.constant 9.99999974E-6 : f32
    %17 = vector.broadcast %cst_10 : f32 to vector<1x128xf32>
    %18 = arith.addf %16, %17 : vector<1x128xf32>
    %19 = math.rsqrt %18 : vector<1x128xf32>
    %20 = arith.mulf %1, %19 : vector<1x128xf32>
    %21 = vector.broadcast %12 : vector<1x128xf32> to vector<8x128xf32>
    %22 = arith.subf %0, %21 : vector<8x128xf32>
    %23 = vector.broadcast %20 : vector<1x128xf32> to vector<8x128xf32>
    %24 = arith.mulf %22, %23 : vector<8x128xf32>
    %25 = vector.broadcast %2 : vector<1x128xf32> to vector<8x128xf32>
    %26 = arith.addf %24, %25 : vector<8x128xf32>
    %cst_11 = arith.constant 0.000000e+00 : f32
    %27 = vector.broadcast %cst_11 : f32 to vector<8x128xf32>
    %28 = arith.maximumf %26, %27 : vector<8x128xf32>
    %29 = arith.truncf %28 : vector<8x128xf32> to vector<8x128xbf16>
    %c0_12 = arith.constant 0 : index
    %c0_13 = arith.constant 0 : index
    %30 = vector.load %arg3[%c0_12, %c0_13] : memref<128x128xbf16, #tpu.memory_space<vmem>>, vector<128x128xbf16>
    %cst_14 = arith.constant dense<0.000000e+00> : vector<8x128xf32>
    %31 = tpu.matmul %29, %30, %cst_14 {dimension_numbers = #tpu.dot_dimension_numbers<[1], [0], [0], [1], [0, 0, 1, 1], [], []>} : vector<8x128xbf16>, vector<128x128xbf16>, vector<8x128xf32> -> vector<8x128xf32>
    %cst_15 = arith.constant dense<0.000000e+00> : vector<128xf32>
    %32 = vector.multi_reduction <add>, %31, %cst_15 [0] : vector<8x128xf32> to vector<128xf32>
    %33 = vector.shape_cast %32 : vector<128xf32> to vector<1x128xf32>
    %34 = arith.mulf %31, %31 : vector<8x128xf32>
    %cst_16 = arith.constant dense<0.000000e+00> : vector<128xf32>
    %35 = vector.multi_reduction <add>, %34, %cst_16 [0] : vector<8x128xf32> to vector<128xf32>
    %36 = vector.shape_cast %35 : vector<128xf32> to vector<1x128xf32>
    %cst_17 = arith.constant 1.250000e-01 : f32
    %37 = vector.broadcast %cst_17 : f32 to vector<1x128xf32>
    %38 = arith.mulf %33, %37 : vector<1x128xf32>
    %cst_18 = arith.constant 1.250000e-01 : f32
    %39 = vector.broadcast %cst_18 : f32 to vector<1x128xf32>
    %40 = arith.mulf %36, %39 : vector<1x128xf32>
    %41 = arith.mulf %38, %38 : vector<1x128xf32>
    %42 = arith.subf %40, %41 : vector<1x128xf32>
    %cst_19 = arith.constant 9.99999974E-6 : f32
    %43 = vector.broadcast %cst_19 : f32 to vector<1x128xf32>
    %44 = arith.addf %42, %43 : vector<1x128xf32>
    %45 = math.rsqrt %44 : vector<1x128xf32>
    %46 = arith.mulf %3, %45 : vector<1x128xf32>
    %47 = vector.broadcast %38 : vector<1x128xf32> to vector<8x128xf32>
    %48 = arith.subf %31, %47 : vector<8x128xf32>
    %49 = vector.broadcast %46 : vector<1x128xf32> to vector<8x128xf32>
    %50 = arith.mulf %48, %49 : vector<8x128xf32>
    %51 = vector.broadcast %4 : vector<1x128xf32> to vector<8x128xf32>
    %52 = arith.addf %50, %51 : vector<8x128xf32>
    %cst_20 = arith.constant 0.000000e+00 : f32
    %53 = vector.broadcast %cst_20 : f32 to vector<8x128xf32>
    %54 = arith.maximumf %52, %53 : vector<8x128xf32>
    %55 = arith.truncf %54 : vector<8x128xf32> to vector<8x128xbf16>
    %c0_21 = arith.constant 0 : index
    %c0_22 = arith.constant 0 : index
    %56 = vector.load %arg4[%c0_21, %c0_22] : memref<128x128xbf16, #tpu.memory_space<vmem>>, vector<128x128xbf16>
    %cst_23 = arith.constant dense<0.000000e+00> : vector<8x128xf32>
    %57 = tpu.matmul %55, %56, %cst_23 {dimension_numbers = #tpu.dot_dimension_numbers<[1], [0], [0], [1], [0, 0, 1, 1], [], []>} : vector<8x128xbf16>, vector<128x128xbf16>, vector<8x128xf32> -> vector<8x128xf32>
    %58 = arith.truncf %0 : vector<8x128xf32> to vector<8x128xbf16>
    %c0_24 = arith.constant 0 : index
    %c0_25 = arith.constant 0 : index
    %59 = vector.load %arg5[%c0_24, %c0_25] : memref<128x128xbf16, #tpu.memory_space<vmem>>, vector<128x128xbf16>
    %cst_26 = arith.constant dense<0.000000e+00> : vector<8x128xf32>
    %60 = tpu.matmul %58, %59, %cst_26 {dimension_numbers = #tpu.dot_dimension_numbers<[1], [0], [0], [1], [0, 0, 1, 1], [], []>} : vector<8x128xbf16>, vector<128x128xbf16>, vector<8x128xf32> -> vector<8x128xf32>
    %61 = arith.addf %60, %57 : vector<8x128xf32>
    %62 = vector.broadcast %5 : vector<1x128xf32> to vector<8x128xf32>
    %63 = arith.addf %61, %62 : vector<8x128xf32>
    %c0_27 = arith.constant 0 : index
    %c0_28 = arith.constant 0 : index
    %64 = vector.load %arg6[%c0_27, %c0_28] : memref<8x128xf32, #tpu.memory_space<vmem>>, vector<8x128xf32>
    tpu.vector_store %arg6[%c0_27, %c0_28], %63 {strides = array<i32>} : memref<8x128xf32, #tpu.memory_space<vmem>>, vector<8x128xf32>,
    return
  }
  func.func @transform_0(%arg0: i32) -> (i32, i32) {
    %c0_i32 = arith.constant 0 : i32
    %c0_i32_0 = arith.constant 0 : i32
    %c0_i32_1 = arith.constant 0 : i32
    return %c0_i32, %c0_i32_0 : i32, i32
  }
  func.func @transform_1(%arg0: i32) -> (i32, i32) {
    %c0_i32 = arith.constant 0 : i32
    %c0_i32_0 = arith.constant 0 : i32
    %c0_i32_1 = arith.constant 0 : i32
    return %c0_i32, %c0_i32_0 : i32, i32
  }
  func.func @transform_2(%arg0: i32) -> (i32, i32) {
    %c0_i32 = arith.constant 0 : i32
    %c0_i32_0 = arith.constant 0 : i32
    %c0_i32_1 = arith.constant 0 : i32
    return %c0_i32, %c0_i32_0 : i32, i32
  }
  func.func @transform_3(%arg0: i32) -> (i32, i32) {
    %c0_i32 = arith.constant 0 : i32
    %c0_i32_0 = arith.constant 0 : i32
    %c0_i32_1 = arith.constant 0 : i32
    return %c0_i32, %c0_i32_0 : i32, i32
  }
  func.func @transform_4(%arg0: i32) -> (i32, i32) {
    %c0_i32 = arith.constant 0 : i32
    %c0_i32_0 = arith.constant 0 : i32
    %c0_i32_1 = arith.constant 0 : i32
    return %c0_i32, %c0_i32_0 : i32, i32
  }
  func.func @transform_5(%arg0: i32) -> (i32, i32) {
    %c0_i32 = arith.constant 0 : i32
    %c0_i32_0 = arith.constant 0 : i32
    %c0_i32_1 = arith.constant 0 : i32
    return %c0_i32, %c0_i32_0 : i32, i32
  }
}

</mosaic_0001>

<bundles_post_ra>
// kernel: tpu_custom_call.1
= control target key start
LH: loop header
LB: loop body
LE: loop exit
PB: predicated region body
PF: predicated region fallthrough
CT: control target
= control target key end

     0   :  { %10 = vsyncpa [#allocation3], 0  ;;  %s779_s0 = inlined_call_operand.hbm [shape: f32[8,128], index: 0, kind: input, shape index: {}]   ;;  %s780_s1 = inlined_call_operand.hbm [shape: f32[8,128], index: 1, kind: input, shape index: {}]   ;;  %s781_s2 = inlined_call_operand.hbm [shape: bf16[128,128], index: 2, kind: input, shape index: {}]   ;;  %s782_s3 = inlined_call_operand.hbm [shape: bf16[128,128], index: 3, kind: input, shape index: {}]   ;;  %s783_s4 = inlined_call_operand.hbm [shape: bf16[128,128], index: 4, kind: input, shape index: {}]   ;;  %s784_s5 = inlined_call_operand.hbm [shape: f32[8,128], index: 5, kind: output, shape index: {}]  }
   0x1   :  { %11 = vsyncpa [#allocation6], 0 }
   0x2   :  { %12 = vsyncpa [#allocation9], 0  ;;  %s30_s20 = sshll.u32 %s780_s1, 4  ;;  %s31_s20 = int_to_ptr.hbm [resolvable:$true] %s30_s20 }
   0x3   :  { %13 = vsyncpa [#allocation4], 0  ;;  %s714_s21 = smov [#allocation5]   ;;  %s53_s25 = sshll.u32 %s782_s3, 4  ;;  %s54_s25 = int_to_ptr.hbm [resolvable:$true] %s53_s25 }
   0x4   :  { %s32_s22 = sshll.u32 %s714_s21, 4  ;;  %s715_s26 = smov [#allocation8]   ;;  %s33_s22 = int_to_ptr.vmem [resolvable:$true] %s32_s22 }
   0x5   :  { %35 = dma.hbm_to_vmem [thread:$0]  %s31_s20, 128, %s33_s22, [#allocation6]  }
   0x6   :  { %s55_s27 = sshll.u32 %s715_s26, 4  ;;  %s19_s30 = sshll.u32 %s779_s0, 4  ;;  %s56_s27 = int_to_ptr.vmem [resolvable:$true] %s55_s27  ;;  %s20_s30 = int_to_ptr.hbm [resolvable:$true] %s19_s30 }
   0x7   :  { %s716_s1 = smov 64   ;;  %s717_s6 = smov 4  }
   0x8   :  { %61 = dma.hbm_to_vmem [thread:$0]  %s54_s25, 1024, %s56_s27, [#allocation9], %s716_s1, %s716_s1, %s717_s6  }
   0x9   :  { %s40_s9 = sshll.u32 %s781_s2, 4  ;;  %s718_s10 = smov [#allocation2]   ;;  %s41_s9 = int_to_ptr.hbm [resolvable:$true] %s40_s9 }
   0xa   :  { %s21_s11 = sshll.u32 %s718_s10, 4  ;;  %s719_s3 = smov [#allocation7]   ;;  %s22_s11 = int_to_ptr.vmem [resolvable:$true] %s21_s11 }
   0xb   :  { %24 = dma.hbm_to_vmem [thread:$0]  %s20_s30, 128, %s22_s11, [#allocation3]  }
   0xc   :  { %s42_s12 = sshll.u32 %s719_s3, 4  ;;  %s66_s0 = sshll.u32 %s783_s4, 4  ;;  %s43_s12 = int_to_ptr.vmem [resolvable:$true] %s42_s12  ;;  %s67_s0 = int_to_ptr.hbm [resolvable:$true] %s66_s0 }
   0xd   :  { %48 = dma.hbm_to_vmem [thread:$0]  %s41_s9, 1024, %s43_s12, [#allocation6], %s716_s1, %s716_s1, %s717_s6  }
   0xe   :  { %s720_s15 = smov [#allocation10]  }
   0xf   :  { %s68_s16 = sshll.u32 %s720_s15, 4  ;;  %s69_s16 = int_to_ptr.vmem [resolvable:$true] %s68_s16 }
  0x10   :  { %74 = dma.hbm_to_vmem [thread:$0]  %s67_s0, 1024, %s69_s16, [#allocation9], %s716_s1, %s716_s1, %s717_s6  }
  0x11   :  { %706 = dma.done.wait [#allocation3], 128  }
  0x12   :  { %707 = vsyncadd [#allocation3], 4294967168 }
  0x13   :  { %708 = dma.done.wait [#allocation6], 1152  }
  0x14   :  { %709 = vsyncadd [#allocation6], 4294966144 }
  0x15   :  { %710 = dma.done.wait [#allocation9], 2048  }
  0x16   :  { %711 = vsyncadd [#allocation9], 4294965248  ;;  %v530_v0 = vld [vmem:[#allocation7 + $0x38] sm:$0xff]  ;;  %v529_v1 = vld [vmem:[#allocation7 + $0x30] sm:$0xff]  ;;  %s721_s2 = smov [#allocation11]   ;;  %s415_s19 = sshll.u32 %s784_s5, 4  ;;  %s416_s19 = int_to_ptr.hbm [resolvable:$true] %s415_s19 }
  0x17   :  { %201 = vmatpush.bf16.msra.mxu0 %v530_v0  ;;  %v767_v2 = vld [vmem:[#allocation2] sm:$0xff]  ;;  %v528_v7 = vld [vmem:[#allocation7 + $0x28] sm:$0xff]  ;;  %v527_v12 = vld [vmem:[#allocation7 + $0x20] sm:$0xff]  ;;  %s413_s4 = sshll.u32 %s721_s2, 4  ;;  %s414_s4 = int_to_ptr.vmem [resolvable:$true] %s413_s4 }
  0x18   :  { %v101_v3 = vrot.slane %v767_v2, 4  ;;  %v107_v4 = vmul.f32 %v767_v2, %v767_v2  ;;  %v526_v17 = vld [vmem:[#allocation7 + $0x18] sm:$0xff]  ;;  %v525_v22 = vld [vmem:[#allocation7 + $0x10] sm:$0xff]  ;;  %v524_v25 = vld [vmem:[#allocation7 + $0x8] sm:$0xff]  ;;  %v327_v59 = vpack.c.bf16 %v767_v2, %v767_v2 }
  0x19   :  { %v523_v26 = vld [vmem:[#allocation7] sm:$0xff]  ;;  %v96_v32 = vld [vmem:[#allocation5] sm:$0x1]  ;;  %v555_v38 = vld [vmem:[#allocation5 + $0x1] ss:$0 sm:$0xff] }
  0x1a   :  { %v102_v5 = vadd.f32 %v101_v3, %v767_v2  ;;  %v108_v6 = vrot.slane %v107_v4, 4  ;;  %v546_v43 = vld [vmem:[#allocation10 + $0x38] sm:$0xff]  ;;  %v545_v44 = vld [vmem:[#allocation10 + $0x30] sm:$0xff]  ;;  %v544_v45 = vld [vmem:[#allocation10 + $0x28] sm:$0xff] }
  0x1b   :  { %202 = vmatpush.bf16.msra.mxu0 %v529_v1  ;;  %392 = vmatpush.bf16.msra.mxu2 %v546_v43  ;;  %v543_v46 = vld [vmem:[#allocation10 + $0x20] sm:$0xff]  ;;  %v538_v47 = vld [vmem:[#allocation8 + $0x38] sm:$0xff]  ;;  %v537_v49 = vld [vmem:[#allocation8 + $0x30] sm:$0xff] }
  0x1c   :  { %v103_v8 = vrot.slane %v102_v5, 2  ;;  %v109_v9 = vadd.f32 %v108_v6, %v107_v4  ;;  %314 = vmatpush.bf16.msra.mxu1 %v538_v47  ;;  %v542_v48 = vld [vmem:[#allocation10 + $0x18] sm:$0xff]  ;;  %v541_v50 = vld [vmem:[#allocation10 + $0x10] sm:$0xff]  ;;  %v536_v51 = vld [vmem:[#allocation8 + $0x28] sm:$0xff] }
  0x1d   :  { %v540_v52 = vld [vmem:[#allocation10 + $0x8] sm:$0xff]  ;;  %v535_v53 = vld [vmem:[#allocation8 + $0x20] sm:$0xff]  ;;  %v534_v56 = vld [vmem:[#allocation8 + $0x18] sm:$0xff] }
  0x1e   :  { %v104_v10 = vadd.f32 %v103_v8, %v102_v5  ;;  %v110_v11 = vrot.slane %v109_v9, 2  ;;  %v539_v54 = vld [vmem:[#allocation10] sm:$0xff]  ;;  %v533_v62 = vld [vmem:[#allocation8 + $0x10] sm:$0xff]  ;;  %v532_v5 = vld [vmem:[#allocation8 + $0x8] sm:$0xff] }
  0x1f   :  { %203 = vmatpush.bf16.msra.mxu0 %v528_v7  ;;  %393 = vmatpush.bf16.msra.mxu2 %v545_v44 }
  0x20   :  { %v105_v13 = vrot.slane %v104_v10, 1  ;;  %v111_v14 = vadd.f32 %v110_v11, %v109_v9  ;;  %315 = vmatpush.bf16.msra.mxu1 %v537_v49 }
  0x22   :  { %v106_v15 = vadd.f32 %v105_v13, %v104_v10  ;;  %v112_v16 = vrot.slane %v111_v14, 1  ;;  %v531_v10 = vld [vmem:[#allocation8] sm:$0xff] }
  0x23   :  { %204 = vmatpush.bf16.msra.mxu0 %v527_v12  ;;  %394 = vmatpush.bf16.msra.mxu2 %v544_v45 }
  0x24   :  { %v113_v18 = vadd.f32 %v112_v16, %v111_v14  ;;  %v114_v19 = vmul.f32 0.125, %v106_v15  ;;  %316 = vmatpush.bf16.msra.mxu1 %v536_v51 }
  0x26   :  { %v115_v20 = vmul.f32 0.125, %v113_v18  ;;  %v116_v21 = vmul.f32 %v114_v19, %v114_v19  ;;  %v130_v36 = vsub.f32 %v767_v2, %v114_v19 }
  0x27   :  { %205 = vmatpush.bf16.msra.mxu0 %v526_v17  ;;  %395 = vmatpush.bf16.msra.mxu2 %v543_v46 }
  0x28   :  { %v117_v23 = vsub.f32 %v115_v20, %v116_v21  ;;  %317 = vmatpush.bf16.msra.mxu1 %v535_v53  ;;  %v98_v21 = vld [vmem:[#allocation5 + $0x2] sm:$0x1] }
  0x2a   :  { %v118_v24 = vadd.f32 1e-05, %v117_v23 }
  0x2b   :  { %206 = vmatpush.bf16.msra.mxu0 %v525_v22  ;;  %396 = vmatpush.bf16.msra.mxu2 %v542_v48 }
  0x2c   :  { %558 = vrsqrt.f32 %v118_v24  ;;  %vm125_vm0 = vweird.f32 %v118_v24  ;;  %318 = vmatpush.bf16.msra.mxu1 %v534_v56 }
  0x2f   :  { %207 = vmatpush.bf16.msra.mxu0 %v524_v25  ;;  %397 = vmatpush.bf16.msra.mxu2 %v541_v50 }
  0x30   :  { %319 = vmatpush.bf16.msra.mxu1 %v533_v62 }
  0x32   :  { %v559_v27 = vpop.eup %558 }
  0x33   :  { %208 = vmatpush.bf16.msra.mxu0 %v523_v26  ;;  %v120_v28 = vmul.f32 %v559_v27, %v118_v24  ;;  %vm126_vm1 = vweird.f32 %v559_v27  ;;  %398 = vmatpush.bf16.msra.mxu2 %v540_v52 }
  0x34   :  { %vm127_vm2 = vmor %vm125_vm0, %vm126_vm1  ;;  %320 = vmatpush.bf16.msra.mxu1 %v532_v5 }
  0x35   :  { %v121_v29 = vmul.f32 %v559_v27, %v120_v28 }
  0x37   :  { %v122_v30 = vmul.f32 0.5, %v121_v29  ;;  %399 = vmatpush.bf16.msra.mxu2 %v539_v54 }
  0x38   :  { %321 = vmatpush.bf16.msra.mxu1 %v531_v10 }
  0x39   :  { %v123_v31 = vsub.f32 1.5, %v122_v30 }
  0x3a   :  { %400 = vmatmul.bf16.vlgmr.msra.gmra.mxu2 %v327_v59 }
  0x3b   :  { %v124_v33 = vmul.f32 %v559_v27, %v123_v31 }
  0x3d   :  { %v128_v34 = vsel %vm127_vm2, %v559_v27, %v124_v33  ;;  %v556_v27 = vld [vmem:[#allocation5 + $0x3] ss:$0 sm:$0xff] }
  0x3e   :  { %v129_v35 = vmul.f32 %v128_v34, %v96_v32  ;;  %v557_v34 = vld [vmem:[#allocation5 + $0x4] ss:$0 sm:$0xff] }
  0x40   :  { %v131_v37 = vperm.slane %v129_v35, 0 }
  0x42   :  { %v132_v39 = vmul.f32 %v131_v37, %v130_v36 }
  0x44   :  { %v134_v40 = vadd.f32 %v555_v38, %v132_v39 }
  0x46   :  { %v135_v41 = vmax.f32 %v134_v40, 0.0 }
  0x48   :  { %v136_v42 = vpack.c.bf16 %v135_v41, %v135_v41 }
  0x4a   :  { %209 = vmatmul.bf16.vlgmr.msra.gmra.mxu0 %v136_v42 }
  0xbd   :  { %v401_v32 = vpop.f32.mrf.mxu2 }
  0xc5   :  { %v403_v33 = vpop.f32.mrf.mxu2 }
  0xc7   :  { %v210_v55 = vpop.f32.mrf.mxu0 }
  0xc8   :  { %v214_v57 = vrot.slane %v210_v55, 4  ;;  %v220_v58 = vmul.f32 %v210_v55, %v210_v55 }
  0xca   :  { %v215_v60 = vadd.f32 %v214_v57, %v210_v55  ;;  %v221_v61 = vrot.slane %v220_v58, 4 }
  0xcc   :  { %v216_v63 = vrot.slane %v215_v60, 2  ;;  %v222_v0 = vadd.f32 %v221_v61, %v220_v58 }
  0xce   :  { %v217_v1 = vadd.f32 %v216_v63, %v215_v60  ;;  %v223_v3 = vrot.slane %v222_v0, 2 }
  0xcf   :  { %v212_v4 = vpop.f32.mrf.mxu0 }
  0xd0   :  { %v218_v6 = vrot.slane %v217_v1, 1  ;;  %v224_v7 = vadd.f32 %v223_v3, %v222_v0 }
  0xd2   :  { %v219_v8 = vadd.f32 %v218_v6, %v217_v1  ;;  %v225_v9 = vrot.slane %v224_v7, 1 }
  0xd4   :  { %v226_v2 = vadd.f32 %v225_v9, %v224_v7  ;;  %v227_v11 = vmul.f32 0.125, %v219_v8 }
  0xd6   :  { %v228_v12 = vmul.f32 0.125, %v226_v2  ;;  %v229_v13 = vmul.f32 %v227_v11, %v227_v11  ;;  %v243_v25 = vsub.f32 %v210_v55, %v227_v11 }
  0xd8   :  { %v230_v14 = vsub.f32 %v228_v12, %v229_v13 }
  0xda   :  { %v231_v15 = vadd.f32 1e-05, %v230_v14 }
  0xdc   :  { %560 = vrsqrt.f32 %v231_v15  ;;  %vm238_vm4 = vweird.f32 %v231_v15 }
  0xe2   :  { %v561_v16 = vpop.eup %560 }
  0xe3   :  { %v233_v17 = vmul.f32 %v561_v16, %v231_v15  ;;  %vm239_vm3 = vweird.f32 %v561_v16 }
  0xe4   :  { %vm240_vm5 = vmor %vm238_vm4, %vm239_vm3 }
  0xe5   :  { %v234_v18 = vmul.f32 %v561_v16, %v233_v17 }
  0xe7   :  { %v235_v19 = vmul.f32 0.5, %v234_v18 }
  0xe9   :  { %v236_v20 = vsub.f32 1.5, %v235_v19 }
  0xeb   :  { %v237_v22 = vmul.f32 %v561_v16, %v236_v20 }
  0xed   :  { %v241_v23 = vsel %vm240_vm5, %v561_v16, %v237_v22 }
  0xee   :  { %v242_v24 = vmul.f32 %v241_v23, %v98_v21 }
  0xf0   :  { %v244_v26 = vperm.slane %v242_v24, 0 }
  0xf2   :  { %v245_v28 = vmul.f32 %v244_v26, %v243_v25 }
  0xf4   :  { %v247_v29 = vadd.f32 %v556_v27, %v245_v28 }
  0xf6   :  { %v248_v30 = vmax.f32 %v247_v29, 0.0 }
  0xf8   :  { %v249_v31 = vpack.c.bf16 %v248_v30, %v248_v30 }
  0xfa   :  { %322 = vmatmul.bf16.vlgmr.msra.gmra.mxu1 %v249_v31 }
 0x177   :  { %v323_v35 = vpop.f32.mrf.mxu1 }
 0x178   :  { %v402_v36 = vadd.f32 %v401_v32, %v323_v35 }
 0x17a   :  { %v406_v37 = vadd.f32 %v557_v34, %v402_v36 }
 0x17c   :  { %407 = vst [vmem:[#allocation11] sm:$0xff] %v406_v37 }
 0x17d   :  { %418 = dma.vmem_to_hbm [thread:$0]  %s414_s4, 128, %s416_s19, [#allocation4]  }
 0x17f   :  { %v325_v38 = vpop.f32.mrf.mxu1 }
 0x180   :  { %712 = dma.done.wait [#allocation4], 128  }
 0x181   :  { %713 = vsyncadd [#allocation4], 4294967168 }
 0x182   :  { %423 = vsyncpa [#allocation3], 1 }
 0x183   :  { %424 = vsyncpa [#allocation6], 1 }
 0x184   :  { %425 = vsyncpa [#allocation9], 1 }
 0x185   :  { %426 = vsyncpa [#allocation4], 1 }

</bundles_post_ra>
